<compile_context>
chip_gen: v7x
topology: tpu7x:2x2x1
jax: 0.10.0
libtpu: 0.0.40
codegen_flags: <defaults>
</compile_context>

<pallas_src>
import functools

import jax
import jax.numpy as jnp
from jax.experimental import pallas as pl
from jax.experimental.pallas import tpu as pltpu


def _csig_kernel(x_ref, o_ref, *, para, bias):
    # compressedSigmoid: 1 / (para + exp(-x)) + bias
    # exp -> EUP slot, add/div -> VPU; kernel is HBM-bandwidth bound.
    x = x_ref[...]
    o_ref[...] = 1.0 / (para + jnp.exp(-x)) + bias


_LANE = 512            # lane-dense last dim (multiple of 128 -> unmasked stores)
_MAX_BLOCK_ROWS = 256  # 256*512*4B = 512 KiB per buffer; in+out double-buffered ~2 MiB VMEM


def compressed_sigmoid(x, para=2.0, bias=0.2):
    """Pallas TPU implementation of compressedSigmoid.forward (any input shape)."""
    orig_shape = x.shape
    orig_dtype = x.dtype

    xf = jnp.ravel(x).astype(jnp.float32)
    n = xf.shape[0]

    # Reshape the flat array into a lane-dense (rows, _LANE) slab.
    rows = pl.cdiv(n, _LANE)
    # Block rows: sublane-aligned (multiple of 8), capped for VMEM friendliness.
    tm = min(_MAX_BLOCK_ROWS, ((rows + 7) // 8) * 8)
    rows_pad = pl.cdiv(rows, tm) * tm
    n_pad = rows_pad * _LANE

    xf = jnp.pad(xf, (0, n_pad - n))          # pad tail with zeros (exp(0) is safe)
    x2d = xf.reshape(rows_pad, _LANE)

    kernel = functools.partial(_csig_kernel, para=float(para), bias=float(bias))

    out2d = pl.pallas_call(
        kernel,
        out_shape=jax.ShapeDtypeStruct((rows_pad, _LANE), jnp.float32),
        grid=(rows_pad // tm,),
        in_specs=[pl.BlockSpec((tm, _LANE), lambda i: (i, 0))],
        out_specs=pl.BlockSpec((tm, _LANE), lambda i: (i, 0)),
        compiler_params=pltpu.CompilerParams(
            dimension_semantics=("parallel",)),
    )(x2d)

    out = out2d.reshape(-1)[:n].reshape(orig_shape)
    return out.astype(orig_dtype)


if __name__ == "__main__":
    key = jax.random.PRNGKey(0)
    # Small deterministic input consistent with the module's elementwise use:
    # batch=2, channels=4, spatial=16x16.
    x = jax.random.normal(key, (2, 4, 16, 16), jnp.float32)

    fwd = jax.jit(compressed_sigmoid)
    y = fwd(x)
    jax.block_until_ready(y)

    # Reference check against the PyTorch formula (para=2.0, bias=0.2).
    ref = 1.0 / (2.0 + jnp.exp(-x)) + 0.2
    assert y.shape == x.shape
    assert y.dtype == x.dtype
    assert jnp.allclose(y, ref, atol=1e-6, rtol=1e-6)

    print("KERNEL_OK")
</pallas_src>

<mosaic_0001>
module attributes {stable_mosaic.version = 11 : i64} {
  func.func @_csig_kernel(%arg0: i32, %arg1: memref<8x512xf32, #tpu.memory_space<vmem>>, %arg2: memref<8x512xf32, #tpu.memory_space<vmem>>) attributes {dimension_semantics = [#tpu.dimension_semantics<parallel>], iteration_bounds = array<i64: 1>, scalar_prefetch = 0 : i64, scratch_operands = 0 : i64, tpu.core_type = #tpu.core_type<tc>, window_params = [{transform_indices = @transform_0, window_bounds = array<i64: 8, 512>}, {transform_indices = @transform_1, window_bounds = array<i64: 8, 512>}]} {
    %c0 = arith.constant 0 : index
    %c0_0 = arith.constant 0 : index
    %0 = vector.load %arg1[%c0, %c0_0] : memref<8x512xf32, #tpu.memory_space<vmem>>, vector<8x512xf32>
    %cst = arith.constant 0.000000e+00 : f32
    %1 = vector.broadcast %cst : f32 to vector<8x512xf32>
    %2 = arith.subf %1, %0 : vector<8x512xf32>
    %3 = math.exp %2 : vector<8x512xf32>
    %cst_1 = arith.constant 2.000000e+00 : f32
    %4 = vector.broadcast %cst_1 : f32 to vector<8x512xf32>
    %5 = arith.addf %4, %3 : vector<8x512xf32>
    %cst_2 = arith.constant 1.000000e+00 : f32
    %6 = vector.broadcast %cst_2 : f32 to vector<8x512xf32>
    %7 = arith.divf %6, %5 : vector<8x512xf32>
    %cst_3 = arith.constant 2.000000e-01 : f32
    %8 = vector.broadcast %cst_3 : f32 to vector<8x512xf32>
    %9 = arith.addf %7, %8 : vector<8x512xf32>
    %c0_4 = arith.constant 0 : index
    %c0_5 = arith.constant 0 : index
    %10 = vector.load %arg2[%c0_4, %c0_5] : memref<8x512xf32, #tpu.memory_space<vmem>>, vector<8x512xf32>
    tpu.vector_store %arg2[%c0_4, %c0_5], %9 {strides = array<i32>} : memref<8x512xf32, #tpu.memory_space<vmem>>, vector<8x512xf32>,
    return
  }
  func.func @transform_0(%arg0: i32) -> (i32, i32) {
    %c0_i32 = arith.constant 0 : i32
    %c0_i32_0 = arith.constant 0 : i32
    return %arg0, %c0_i32 : i32, i32
  }
  func.func @transform_1(%arg0: i32) -> (i32, i32) {
    %c0_i32 = arith.constant 0 : i32
    %c0_i32_0 = arith.constant 0 : i32
    return %arg0, %c0_i32 : i32, i32
  }
}

</mosaic_0001>

<bundles_post_ra>
// kernel: compressed_sigmoid.1
= control target key start
LH: loop header
LB: loop body
LE: loop exit
PB: predicated region body
PF: predicated region fallthrough
CT: control target
= control target key end

     0   :  { %s98_s0 = inlined_call_operand.vmem [shape: f32[8,512], index: 0, kind: input, shape index: {}]   ;;  %s99_s1 = inlined_call_operand.vmem [shape: f32[8,512], index: 1, kind: output, shape index: {}]  }
   0x1   :  { %v8_v0 = vld [vmem:[%s98_s0] sm:$0xff]  ;;  %v9_v1 = vld [vmem:[%s98_s0 + $0x8] sm:$0xff]  ;;  %v10_v2 = vld [vmem:[%s98_s0 + $0x10] sm:$0xff] }
   0x2   :  { %v12_v3 = vsub.f32 0.0, %v8_v0  ;;  %v13_v4 = vsub.f32 0.0, %v9_v1  ;;  %v14_v5 = vsub.f32 0.0, %v10_v2  ;;  %v11_v6 = vld [vmem:[%s98_s0 + $0x18] sm:$0xff] }
   0x3   :  { %v15_v7 = vsub.f32 0.0, %v11_v6 }
   0x4   :  { %v16_v8 = vmul.f32 1.442695, %v12_v3  ;;  %v18_v9 = vmul.f32 1.442695, %v13_v4  ;;  %v20_v10 = vmul.f32 1.442695, %v14_v5 }
   0x5   :  { %v22_v11 = vmul.f32 1.442695, %v15_v7 }
   0x6   :  { %48 = vpow2.f32 %v16_v8 }
   0x7   :  { %50 = vpow2.f32 %v18_v9 }
   0x8   :  { %52 = vpow2.f32 %v20_v10 }
   0x9   :  { %54 = vpow2.f32 %v22_v11 }
  0x10   :  { %v49_v12 = vpop.eup %48 }
  0x11   :  { %v51_v13 = vpop.eup %50  ;;  %v24_v14 = vadd.f32 2.0, %v49_v12 }
  0x12   :  { %v53_v15 = vpop.eup %52  ;;  %v25_v16 = vadd.f32 2.0, %v51_v13 }
  0x13   :  { %v55_v17 = vpop.eup %54  ;;  %56 = vrcp.f32 %v24_v14  ;;  %v26_v18 = vadd.f32 2.0, %v53_v15 }
  0x14   :  { %58 = vrcp.f32 %v25_v16  ;;  %v27_v19 = vadd.f32 2.0, %v55_v17 }
  0x15   :  { %60 = vrcp.f32 %v26_v18 }
  0x16   :  { %62 = vrcp.f32 %v27_v19 }
  0x1d   :  { %v57_v20 = vpop.eup %56 }
  0x1e   :  { %v59_v21 = vpop.eup %58  ;;  %v36_v22 = vadd.f32 0.2, %v57_v20 }
  0x1f   :  { %v61_v23 = vpop.eup %60  ;;  %v37_v24 = vadd.f32 0.2, %v59_v21 }
  0x20   :  { %v63_v25 = vpop.eup %62  ;;  %40 = vst [vmem:[%s99_s1] sm:$0xff] %v36_v22  ;;  %v38_v26 = vadd.f32 0.2, %v61_v23 }
  0x21   :  { %41 = vst [vmem:[%s99_s1 + $0x8] sm:$0xff] %v37_v24  ;;  %v39_v27 = vadd.f32 0.2, %v63_v25 }
  0x22   :  { %42 = vst [vmem:[%s99_s1 + $0x10] sm:$0xff] %v38_v26 }
  0x23   :  { %43 = vst [vmem:[%s99_s1 + $0x18] sm:$0xff] %v39_v27 }

</bundles_post_ra>
